<compile_context>
chip_gen: v7x
topology: tpu7x:2x2x1
jax: 0.10.0
libtpu: 0.0.40
codegen_flags: <defaults>
</compile_context>

<pallas_src>
import functools

import jax
import jax.numpy as jnp
from jax import lax
from jax.experimental import pallas as pl
from jax.experimental.pallas import tpu as pltpu


def _srnn_ve_kernel(variant, x_ref, wih_ref, whh_ref, b_ref, wfc_ref, bfc_ref,
                    h0_ref, out_ref, hseq_ref):
    """Single-invocation kernel: full-sequence recurrence + head.

    Whole-array VMEM blocks:
      x_ref:    (B, T, I)   batch-first input
      wih_ref:  (I, H)      W_ih^T
      whh_ref:  (H, H)      W_hh^T
      b_ref:    (1, H)      b_ih + b_hh
      wfc_ref:  (H, O)      W_fc^T
      bfc_ref:  (1, O)
      h0_ref:   (B, H)
      out_ref:  (B, O)
      hseq_ref: (B, T, H)   batch-first hidden sequence
    """
    B, T, I = x_ref.shape
    H = whh_ref.shape[0]

    # ---- Hoisted input projection: T per-step (B, H) slabs, computed off the
    # serial path as VPU broadcast mul-adds (I is tiny, so no K=1 MXU matmuls
    # and no (B,T,H) intermediate that would need per-step sublane slicing).
    x = x_ref[...]                                                  # (B, T, I)
    b = b_ref[...]                                                  # (1, H)
    wih = wih_ref[...]                                              # (I, H)
    xproj = []
    for t in range(T):
        p = jnp.zeros((B, H), jnp.float32) + b                      # (B, H)
        for i in range(I):                                          # I is tiny (=1)
            p = p + x[:, t, i:i + 1] * wih[i:i + 1, :]
        xproj.append(p)

    # ---- Serial recurrence: h stays in vregs; loop unrolled (T small+static).
    # Only add -> matmul -> tanh on the critical path; hseq stores deferred.
    whh = whh_ref[...]                                              # (H, H)
    h = h0_ref[...]                                                 # (B, H)
    hs = []
    for t in range(T):
        h = jnp.tanh(xproj[t] +
                     jnp.dot(h, whh, preferred_element_type=jnp.float32))
        hs.append(h)

    # ---- Single deferred writeback of the whole hidden sequence.
    hseq_ref[...] = jnp.stack(hs, axis=1).astype(hseq_ref.dtype)    # (B, T, H)

    # ---- Head (once, on h_T).
    wfc = wfc_ref[...]                                              # (H, O)
    bfc = bfc_ref[...]                                              # (1, O)
    if variant == 'VE2':
        g = jnp.sqrt(jnp.abs(h) + 1e-8)
        out = jnp.dot(g, wfc, preferred_element_type=jnp.float32) + bfc
    elif variant == 'VE3':
        # Linearity: fc(h) + fc(g) == (h + g) @ W_fc + 2*b_fc  -> one matmul.
        g = jnp.sqrt(jnp.abs(h) + 1e-8)
        out = -jnp.abs(jnp.dot(h + g, wfc, preferred_element_type=jnp.float32)
                       + 2.0 * bfc)
    else:  # 'VE1' (default)
        out = jnp.dot(h, wfc, preferred_element_type=jnp.float32) + bfc
    out_ref[...] = out.astype(out_ref.dtype)


def srnn_ve_forward(x, params, variant='VE1', h0=None):
    """x: (B, T, I) float32 (batch_first, like PyTorch). Returns (out, h_seq)."""
    B, T, I = x.shape
    H = params['w_hh'].shape[0]
    O = params['w_fc'].shape[1]
    if h0 is None:
        h0 = jnp.zeros((B, H), jnp.float32)
    b = (params['b_ih'] + params['b_hh']).reshape(1, H)   # sum biases (PyTorch has two)

    vmem = pl.BlockSpec(memory_space=pltpu.MemorySpace.VMEM)
    out, hseq = pl.pallas_call(
        functools.partial(_srnn_ve_kernel, variant),
        out_shape=(jax.ShapeDtypeStruct((B, O), jnp.float32),
                   jax.ShapeDtypeStruct((B, T, H), jnp.float32)),
        in_specs=[vmem] * 7,
        out_specs=(vmem, vmem),
    )(x, params['w_ih'], params['w_hh'], b, params['w_fc'], params['b_fc'], h0)
    return out, hseq


def init_params(key, input_size=1, hidden_size=10, output_size=2):
    """Deterministic init mirroring the module: xavier_uniform weights, zero biases."""
    k1, k2, k3 = jax.random.split(key, 3)

    def xavier(k, torch_shape):                     # torch 2D: (fan_out, fan_in)
        fan_out, fan_in = torch_shape
        bound = (6.0 / (fan_in + fan_out)) ** 0.5
        return jax.random.uniform(k, torch_shape, jnp.float32, -bound, bound)

    w_ih_torch = xavier(k1, (hidden_size, input_size))    # (H, I)
    w_hh_torch = xavier(k2, (hidden_size, hidden_size))   # (H, H)
    w_fc_torch = xavier(k3, (output_size, hidden_size))   # (O, H)

    return {
        'w_ih': jnp.transpose(w_ih_torch),                # (I, H)
        'w_hh': jnp.transpose(w_hh_torch),                # (H, H)
        'b_ih': jnp.zeros((hidden_size,), jnp.float32),
        'b_hh': jnp.zeros((hidden_size,), jnp.float32),
        'w_fc': jnp.transpose(w_fc_torch),                # (H, O)
        'b_fc': jnp.zeros((1, output_size), jnp.float32),
    }


def ref_forward(x, params, variant):
    """Pure-JAX reference (lax.scan) for correctness checking."""
    B, T, I = x.shape
    H = params['w_hh'].shape[0]
    h0 = jnp.zeros((B, H), jnp.float32)
    b = params['b_ih'] + params['b_hh']

    def step(h, x_t):
        h_new = jnp.tanh(x_t @ params['w_ih'] + h @ params['w_hh'] + b)
        return h_new, h_new

    h_last, hseq_tm = lax.scan(step, h0, jnp.transpose(x, (1, 0, 2)))

    def fc(h):
        return h @ params['w_fc'] + params['b_fc']

    if variant == 'VE2':
        out = fc(jnp.sqrt(jnp.abs(h_last) + 1e-8))
    elif variant == 'VE3':
        out = -jnp.abs(fc(h_last) + fc(jnp.sqrt(jnp.abs(h_last) + 1e-8)))
    else:
        out = fc(h_last)
    return out, jnp.transpose(hseq_tm, (1, 0, 2))


if __name__ == "__main__":
    key = jax.random.PRNGKey(0)
    pkey, xkey = jax.random.split(key)

    B, T, I, H, O = 4, 8, 1, 10, 2
    params = init_params(pkey, input_size=I, hidden_size=H, output_size=O)
    x = jax.random.normal(xkey, (B, T, I), jnp.float32)

    import numpy as np
    for variant in ('VE1', 'VE2', 'VE3'):
        out, hseq = srnn_ve_forward(x, params, variant=variant)
        out = jax.block_until_ready(out)
        hseq = jax.block_until_ready(hseq)
        out_ref, hseq_ref = ref_forward(x, params, variant)
        np.testing.assert_allclose(np.asarray(out), np.asarray(out_ref),
                                   rtol=1e-5, atol=1e-5)
        np.testing.assert_allclose(np.asarray(hseq), np.asarray(hseq_ref),
                                   rtol=1e-5, atol=1e-5)
    print("KERNEL_OK")
</pallas_src>

<mosaic_0001>
module attributes {stable_mosaic.version = 11 : i64} {
  func.func @_srnn_ve_kernel(%arg0: memref<4x8x1xf32, #tpu.memory_space<vmem>>, %arg1: memref<1x10xf32, #tpu.memory_space<vmem>>, %arg2: memref<10x10xf32, #tpu.memory_space<vmem>>, %arg3: memref<1x10xf32, #tpu.memory_space<vmem>>, %arg4: memref<10x2xf32, #tpu.memory_space<vmem>>, %arg5: memref<1x2xf32, #tpu.memory_space<vmem>>, %arg6: memref<4x10xf32, #tpu.memory_space<vmem>>, %arg7: memref<4x2xf32, #tpu.memory_space<vmem>>, %arg8: memref<4x8x10xf32, #tpu.memory_space<vmem>>) attributes {dimension_semantics = [], scalar_prefetch = 0 : i64, scratch_operands = 0 : i64, tpu.core_type = #tpu.core_type<tc>} {
    %c0 = arith.constant 0 : index
    %c0_0 = arith.constant 0 : index
    %c0_1 = arith.constant 0 : index
    %0 = vector.load %arg0[%c0, %c0_0, %c0_1] : memref<4x8x1xf32, #tpu.memory_space<vmem>>, vector<4x8x1xf32>
    %c0_2 = arith.constant 0 : index
    %c0_3 = arith.constant 0 : index
    %1 = vector.load %arg3[%c0_2, %c0_3] : memref<1x10xf32, #tpu.memory_space<vmem>>, vector<1x10xf32>
    %c0_4 = arith.constant 0 : index
    %c0_5 = arith.constant 0 : index
    %2 = vector.load %arg1[%c0_4, %c0_5] : memref<1x10xf32, #tpu.memory_space<vmem>>, vector<1x10xf32>
    %cst = arith.constant 0.000000e+00 : f32
    %3 = vector.broadcast %cst : f32 to vector<4x10xf32>
    %4 = vector.broadcast %1 : vector<1x10xf32> to vector<4x10xf32>
    %5 = arith.addf %3, %4 : vector<4x10xf32>
    %6 = vector.extract_strided_slice %0 {offsets = [0, 0, 0], sizes = [4, 1, 1], strides = [1, 1, 1]} : vector<4x8x1xf32> to vector<4x1x1xf32>
    %7 = vector.shape_cast %6 : vector<4x1x1xf32> to vector<4x1xf32>
    %8 = vector.broadcast %7 : vector<4x1xf32> to vector<4x10xf32>
    %9 = vector.broadcast %2 : vector<1x10xf32> to vector<4x10xf32>
    %10 = arith.mulf %8, %9 : vector<4x10xf32>
    %11 = arith.addf %5, %10 : vector<4x10xf32>
    %cst_6 = arith.constant 0.000000e+00 : f32
    %12 = vector.broadcast %cst_6 : f32 to vector<4x10xf32>
    %13 = vector.broadcast %1 : vector<1x10xf32> to vector<4x10xf32>
    %14 = arith.addf %12, %13 : vector<4x10xf32>
    %15 = vector.extract_strided_slice %0 {offsets = [0, 1, 0], sizes = [4, 1, 1], strides = [1, 1, 1]} : vector<4x8x1xf32> to vector<4x1x1xf32>
    %16 = vector.shape_cast %15 : vector<4x1x1xf32> to vector<4x1xf32>
    %17 = vector.broadcast %16 : vector<4x1xf32> to vector<4x10xf32>
    %18 = vector.broadcast %2 : vector<1x10xf32> to vector<4x10xf32>
    %19 = arith.mulf %17, %18 : vector<4x10xf32>
    %20 = arith.addf %14, %19 : vector<4x10xf32>
    %cst_7 = arith.constant 0.000000e+00 : f32
    %21 = vector.broadcast %cst_7 : f32 to vector<4x10xf32>
    %22 = vector.broadcast %1 : vector<1x10xf32> to vector<4x10xf32>
    %23 = arith.addf %21, %22 : vector<4x10xf32>
    %24 = vector.extract_strided_slice %0 {offsets = [0, 2, 0], sizes = [4, 1, 1], strides = [1, 1, 1]} : vector<4x8x1xf32> to vector<4x1x1xf32>
    %25 = vector.shape_cast %24 : vector<4x1x1xf32> to vector<4x1xf32>
    %26 = vector.broadcast %25 : vector<4x1xf32> to vector<4x10xf32>
    %27 = vector.broadcast %2 : vector<1x10xf32> to vector<4x10xf32>
    %28 = arith.mulf %26, %27 : vector<4x10xf32>
    %29 = arith.addf %23, %28 : vector<4x10xf32>
    %cst_8 = arith.constant 0.000000e+00 : f32
    %30 = vector.broadcast %cst_8 : f32 to vector<4x10xf32>
    %31 = vector.broadcast %1 : vector<1x10xf32> to vector<4x10xf32>
    %32 = arith.addf %30, %31 : vector<4x10xf32>
    %33 = vector.extract_strided_slice %0 {offsets = [0, 3, 0], sizes = [4, 1, 1], strides = [1, 1, 1]} : vector<4x8x1xf32> to vector<4x1x1xf32>
    %34 = vector.shape_cast %33 : vector<4x1x1xf32> to vector<4x1xf32>
    %35 = vector.broadcast %34 : vector<4x1xf32> to vector<4x10xf32>
    %36 = vector.broadcast %2 : vector<1x10xf32> to vector<4x10xf32>
    %37 = arith.mulf %35, %36 : vector<4x10xf32>
    %38 = arith.addf %32, %37 : vector<4x10xf32>
    %cst_9 = arith.constant 0.000000e+00 : f32
    %39 = vector.broadcast %cst_9 : f32 to vector<4x10xf32>
    %40 = vector.broadcast %1 : vector<1x10xf32> to vector<4x10xf32>
    %41 = arith.addf %39, %40 : vector<4x10xf32>
    %42 = vector.extract_strided_slice %0 {offsets = [0, 4, 0], sizes = [4, 1, 1], strides = [1, 1, 1]} : vector<4x8x1xf32> to vector<4x1x1xf32>
    %43 = vector.shape_cast %42 : vector<4x1x1xf32> to vector<4x1xf32>
    %44 = vector.broadcast %43 : vector<4x1xf32> to vector<4x10xf32>
    %45 = vector.broadcast %2 : vector<1x10xf32> to vector<4x10xf32>
    %46 = arith.mulf %44, %45 : vector<4x10xf32>
    %47 = arith.addf %41, %46 : vector<4x10xf32>
    %cst_10 = arith.constant 0.000000e+00 : f32
    %48 = vector.broadcast %cst_10 : f32 to vector<4x10xf32>
    %49 = vector.broadcast %1 : vector<1x10xf32> to vector<4x10xf32>
    %50 = arith.addf %48, %49 : vector<4x10xf32>
    %51 = vector.extract_strided_slice %0 {offsets = [0, 5, 0], sizes = [4, 1, 1], strides = [1, 1, 1]} : vector<4x8x1xf32> to vector<4x1x1xf32>
    %52 = vector.shape_cast %51 : vector<4x1x1xf32> to vector<4x1xf32>
    %53 = vector.broadcast %52 : vector<4x1xf32> to vector<4x10xf32>
    %54 = vector.broadcast %2 : vector<1x10xf32> to vector<4x10xf32>
    %55 = arith.mulf %53, %54 : vector<4x10xf32>
    %56 = arith.addf %50, %55 : vector<4x10xf32>
    %cst_11 = arith.constant 0.000000e+00 : f32
    %57 = vector.broadcast %cst_11 : f32 to vector<4x10xf32>
    %58 = vector.broadcast %1 : vector<1x10xf32> to vector<4x10xf32>
    %59 = arith.addf %57, %58 : vector<4x10xf32>
    %60 = vector.extract_strided_slice %0 {offsets = [0, 6, 0], sizes = [4, 1, 1], strides = [1, 1, 1]} : vector<4x8x1xf32> to vector<4x1x1xf32>
    %61 = vector.shape_cast %60 : vector<4x1x1xf32> to vector<4x1xf32>
    %62 = vector.broadcast %61 : vector<4x1xf32> to vector<4x10xf32>
    %63 = vector.broadcast %2 : vector<1x10xf32> to vector<4x10xf32>
    %64 = arith.mulf %62, %63 : vector<4x10xf32>
    %65 = arith.addf %59, %64 : vector<4x10xf32>
    %cst_12 = arith.constant 0.000000e+00 : f32
    %66 = vector.broadcast %cst_12 : f32 to vector<4x10xf32>
    %67 = vector.broadcast %1 : vector<1x10xf32> to vector<4x10xf32>
    %68 = arith.addf %66, %67 : vector<4x10xf32>
    %69 = vector.extract_strided_slice %0 {offsets = [0, 7, 0], sizes = [4, 1, 1], strides = [1, 1, 1]} : vector<4x8x1xf32> to vector<4x1x1xf32>
    %70 = vector.shape_cast %69 : vector<4x1x1xf32> to vector<4x1xf32>
    %71 = vector.broadcast %70 : vector<4x1xf32> to vector<4x10xf32>
    %72 = vector.broadcast %2 : vector<1x10xf32> to vector<4x10xf32>
    %73 = arith.mulf %71, %72 : vector<4x10xf32>
    %74 = arith.addf %68, %73 : vector<4x10xf32>
    %c0_13 = arith.constant 0 : index
    %c0_14 = arith.constant 0 : index
    %75 = vector.load %arg2[%c0_13, %c0_14] : memref<10x10xf32, #tpu.memory_space<vmem>>, vector<10x10xf32>
    %c0_15 = arith.constant 0 : index
    %c0_16 = arith.constant 0 : index
    %76 = vector.load %arg6[%c0_15, %c0_16] : memref<4x10xf32, #tpu.memory_space<vmem>>, vector<4x10xf32>
    %cst_17 = arith.constant dense<0.000000e+00> : vector<4x10xf32>
    %77 = tpu.matmul %76, %75, %cst_17 {dimension_numbers = #tpu.dot_dimension_numbers<[1], [0], [0], [1], [0, 0, 1, 1], [], []>} : vector<4x10xf32>, vector<10x10xf32>, vector<4x10xf32> -> vector<4x10xf32>
    %78 = arith.addf %11, %77 : vector<4x10xf32>
    %79 = math.tanh %78 : vector<4x10xf32>
    %cst_18 = arith.constant dense<0.000000e+00> : vector<4x10xf32>
    %80 = tpu.matmul %79, %75, %cst_18 {dimension_numbers = #tpu.dot_dimension_numbers<[1], [0], [0], [1], [0, 0, 1, 1], [], []>} : vector<4x10xf32>, vector<10x10xf32>, vector<4x10xf32> -> vector<4x10xf32>
    %81 = arith.addf %20, %80 : vector<4x10xf32>
    %82 = math.tanh %81 : vector<4x10xf32>
    %cst_19 = arith.constant dense<0.000000e+00> : vector<4x10xf32>
    %83 = tpu.matmul %82, %75, %cst_19 {dimension_numbers = #tpu.dot_dimension_numbers<[1], [0], [0], [1], [0, 0, 1, 1], [], []>} : vector<4x10xf32>, vector<10x10xf32>, vector<4x10xf32> -> vector<4x10xf32>
    %84 = arith.addf %29, %83 : vector<4x10xf32>
    %85 = math.tanh %84 : vector<4x10xf32>
    %cst_20 = arith.constant dense<0.000000e+00> : vector<4x10xf32>
    %86 = tpu.matmul %85, %75, %cst_20 {dimension_numbers = #tpu.dot_dimension_numbers<[1], [0], [0], [1], [0, 0, 1, 1], [], []>} : vector<4x10xf32>, vector<10x10xf32>, vector<4x10xf32> -> vector<4x10xf32>
    %87 = arith.addf %38, %86 : vector<4x10xf32>
    %88 = math.tanh %87 : vector<4x10xf32>
    %cst_21 = arith.constant dense<0.000000e+00> : vector<4x10xf32>
    %89 = tpu.matmul %88, %75, %cst_21 {dimension_numbers = #tpu.dot_dimension_numbers<[1], [0], [0], [1], [0, 0, 1, 1], [], []>} : vector<4x10xf32>, vector<10x10xf32>, vector<4x10xf32> -> vector<4x10xf32>
    %90 = arith.addf %47, %89 : vector<4x10xf32>
    %91 = math.tanh %90 : vector<4x10xf32>
    %cst_22 = arith.constant dense<0.000000e+00> : vector<4x10xf32>
    %92 = tpu.matmul %91, %75, %cst_22 {dimension_numbers = #tpu.dot_dimension_numbers<[1], [0], [0], [1], [0, 0, 1, 1], [], []>} : vector<4x10xf32>, vector<10x10xf32>, vector<4x10xf32> -> vector<4x10xf32>
    %93 = arith.addf %56, %92 : vector<4x10xf32>
    %94 = math.tanh %93 : vector<4x10xf32>
    %cst_23 = arith.constant dense<0.000000e+00> : vector<4x10xf32>
    %95 = tpu.matmul %94, %75, %cst_23 {dimension_numbers = #tpu.dot_dimension_numbers<[1], [0], [0], [1], [0, 0, 1, 1], [], []>} : vector<4x10xf32>, vector<10x10xf32>, vector<4x10xf32> -> vector<4x10xf32>
    %96 = arith.addf %65, %95 : vector<4x10xf32>
    %97 = math.tanh %96 : vector<4x10xf32>
    %cst_24 = arith.constant dense<0.000000e+00> : vector<4x10xf32>
    %98 = tpu.matmul %97, %75, %cst_24 {dimension_numbers = #tpu.dot_dimension_numbers<[1], [0], [0], [1], [0, 0, 1, 1], [], []>} : vector<4x10xf32>, vector<10x10xf32>, vector<4x10xf32> -> vector<4x10xf32>
    %99 = arith.addf %74, %98 : vector<4x10xf32>
    %100 = math.tanh %99 : vector<4x10xf32>
    %101 = vector.shape_cast %79 : vector<4x10xf32> to vector<4x1x10xf32>
    %102 = vector.shape_cast %82 : vector<4x10xf32> to vector<4x1x10xf32>
    %103 = vector.shape_cast %85 : vector<4x10xf32> to vector<4x1x10xf32>
    %104 = vector.shape_cast %88 : vector<4x10xf32> to vector<4x1x10xf32>
    %105 = vector.shape_cast %91 : vector<4x10xf32> to vector<4x1x10xf32>
    %106 = vector.shape_cast %94 : vector<4x10xf32> to vector<4x1x10xf32>
    %107 = vector.shape_cast %97 : vector<4x10xf32> to vector<4x1x10xf32>
    %108 = vector.shape_cast %100 : vector<4x10xf32> to vector<4x1x10xf32>
    %109 = tpu.concatenate %101, %102, %103, %104, %105, %106, %107, %108 in 1 : vector<4x1x10xf32>, vector<4x1x10xf32>, vector<4x1x10xf32>, vector<4x1x10xf32>, vector<4x1x10xf32>, vector<4x1x10xf32>, vector<4x1x10xf32>, vector<4x1x10xf32> -> vector<4x8x10xf32>
    %c0_25 = arith.constant 0 : index
    %c0_26 = arith.constant 0 : index
    %c0_27 = arith.constant 0 : index
    %110 = vector.load %arg8[%c0_25, %c0_26, %c0_27] : memref<4x8x10xf32, #tpu.memory_space<vmem>>, vector<4x8x10xf32>
    tpu.vector_store %arg8[%c0_25, %c0_26, %c0_27], %109 {strides = array<i32>} : memref<4x8x10xf32, #tpu.memory_space<vmem>>, vector<4x8x10xf32>,
    %c0_28 = arith.constant 0 : index
    %c0_29 = arith.constant 0 : index
    %111 = vector.load %arg4[%c0_28, %c0_29] : memref<10x2xf32, #tpu.memory_space<vmem>>, vector<10x2xf32>
    %c0_30 = arith.constant 0 : index
    %c0_31 = arith.constant 0 : index
    %112 = vector.load %arg5[%c0_30, %c0_31] : memref<1x2xf32, #tpu.memory_space<vmem>>, vector<1x2xf32>
    %cst_32 = arith.constant dense<0.000000e+00> : vector<4x2xf32>
    %113 = tpu.matmul %100, %111, %cst_32 {dimension_numbers = #tpu.dot_dimension_numbers<[1], [0], [0], [1], [0, 0, 1, 1], [], []>} : vector<4x10xf32>, vector<10x2xf32>, vector<4x2xf32> -> vector<4x2xf32>
    %114 = vector.broadcast %112 : vector<1x2xf32> to vector<4x2xf32>
    %115 = arith.addf %113, %114 : vector<4x2xf32>
    %c0_33 = arith.constant 0 : index
    %c0_34 = arith.constant 0 : index
    %116 = vector.load %arg7[%c0_33, %c0_34] : memref<4x2xf32, #tpu.memory_space<vmem>>, vector<4x2xf32>
    tpu.vector_store %arg7[%c0_33, %c0_34], %115 {strides = array<i32>} : memref<4x2xf32, #tpu.memory_space<vmem>>, vector<4x2xf32>,
    return
  }
}

</mosaic_0001>

<bundles_post_ra>
// kernel: tpu_custom_call.1
= control target key start
LH: loop header
LB: loop body
LE: loop exit
PB: predicated region body
PF: predicated region fallthrough
CT: control target
= control target key end

     0   :  { %vm154_vm0 = vcmask 1041408   ;;  %v1434_v2 = vmov 0.0|0.0   ;;  %vm1435_vm1 = vmmov 1   ;;  %vm1436_vm3 = vmmov 0   ;;  %s1734_s0 = inlined_call_operand.vmem [shape: f32[4,8,1], index: 0, kind: input, shape index: {}]   ;;  %s1735_s1 = inlined_call_operand.vmem [shape: f32[1,10], index: 1, kind: input, shape index: {}]   ;;  %s1736_s2 = inlined_call_operand.vmem [shape: f32[10,10], index: 2, kind: input, shape index: {}]   ;;  %s1737_s3 = inlined_call_operand.vmem [shape: f32[1,10], index: 3, kind: input, shape index: {}]   ;;  %s1738_s4 = inlined_call_operand.vmem [shape: f32[10,2], index: 4, kind: input, shape index: {}]   ;;  %s1739_s5 = inlined_call_operand.vmem [shape: f32[1,2], index: 5, kind: input, shape index: {}]   ;;  %s1740_s6 = inlined_call_operand.vmem [shape: f32[4,10], index: 6, kind: input, shape index: {}]   ;;  %s1741_s7 = inlined_call_operand.vmem [shape: f32[4,2], index: 7, kind: output, shape index: {0}]   ;;  %s1742_s8 = inlined_call_operand.hbm [shape: f32[4,8,10], index: 8, kind: output, shape index: {1}]  }
   0x1   :  { %v147_v0 = vld [vmem:[%s1736_s2] sm:$0xff]  ;;  %v148_v1 = vld [vmem:[%s1736_s2 + $0x8] sm:$0x3]  ;;  %1347 = vmatprep.subr.bf16.mxu0 %v1434_v2  ;;  %vm1498_vm2 = vmpackc.low %vm154_vm0, %vm1435_vm1  ;;  %1351 = vmatprep.subr.bf16.mxu1 %v1434_v2  ;;  %v1437_v6 = vmov 0.0   ;;  %vm150_vm4 = vcmask 80896   ;;  %v1438_v9 = vmov 0  }
   0x2   :  { %v1495_v3 = vpack.c.bf16 %v148_v1, %v147_v0  ;;  %v30_v5 = vld [vmem:[%s1734_s0 + $0x8] sm:$0xff]  ;;  %1288 = vmatprep.mubr.msk.f32.mxu0 %vm1436_vm3, %v1437_v6  ;;  %v29_v7 = vld [vmem:[%s1734_s0] sm:$0xff]  ;;  %1295 = vmatprep.mubr.msk.f32.mxu1 %vm1436_vm3, %v1437_v6 }
   0x3   :  { %v149_v8 = vld [vmem:[%s1740_s6] sm:$0xf]  ;;  %1392 = vset.pattern.permute.xlu0 %v1438_v9 }
   0x4   :  { %1350 = vmatpush3.bf16.msk.msra.mxu0 %vm1498_vm2, %v1495_v3 }
   0x5   :  { %14 = vsyncpa [#allocation3], 0  ;;  %1393 = vset.pattern.permute.xlu1 %v1438_v9  ;;  %49 = vperm.xlu0 %1392, %v30_v5   ;;  %v31_v10 = vld [vmem:[%s1734_s0 + $0x10] sm:$0xff]  ;;  %v32_v11 = vld [vmem:[%s1734_s0 + $0x18] sm:$0xff]  ;;  %vm77_vm5 = vcmask 1041409   ;;  %vm80_vm6 = vcmask 1042434  }
   0x6   :  { %44 = vperm.xlu1 %1393, %v29_v7   ;;  %1354 = vmatpush3.bf16.msk.msra.mxu1 %vm1498_vm2, %v1495_v3  ;;  %v1237_v12 = vld [vmem:[%s1735_s1] ss:$0 sm:$0xff]  ;;  %vm83_vm7 = vcmask 1043459   ;;  %vm1092_vm8 = vcmask 1040384   ;;  %vm1101_vm9 = vcmask 1042432   ;;  %vm1106_vm10 = vcmask 1043456  }
   0x7   :  { %1289 = vmatmul.mubr.msk.f32.vlgmr.msra.gmra.mrb[0].mxu0 %vm150_vm4, %v149_v8  ;;  %1355 = vmatprep.subr.bf16.mxu0 %v1434_v2  ;;  %v1236_v35 = vld [vmem:[%s1737_s3] ss:$0 sm:$0xff]  ;;  %vm1111_vm11 = vcmask 1044480   ;;  %vm1116_vm12 = vcmask 1045504   ;;  %vm1121_vm13 = vcmask 1046528  }
   0x8   :  { %1358 = vmatpush3.bf16.msk.msra.mxu0 %vm1498_vm2, %v1495_v3  ;;  %1302 = vmatprep.mubr.msk.f32.mxu0 %vm1436_vm3, %v1437_v6 }
   0x9   :  { %54 = vperm.xlu0 %1392, %v31_v10   ;;  %1359 = vmatprep.subr.bf16.mxu1 %v1434_v2 }
   0xa   :  { %59 = vperm.xlu1 %1393, %v32_v11   ;;  %1363 = vmatprep.subr.bf16.mxu0 %v1434_v2 }
  0x84   :  { %v50_v13 = vpop.permute.xlu0 %49 }
  0x85   :  { %v1540_v14 = vmul.f32 %v1237_v12, %v50_v13  ;;  %v45_v15 = vpop.permute.xlu1 %44 }
  0x86   :  { %v1542_v16 = vmul.f32 %v1237_v12, %v45_v15 }
  0x87   :  { %v96_v17 = vrot.slane %v1540_v14, 1  ;;  %v104_v18 = vrot.slane %v1540_v14, 2  ;;  %v112_v19 = vrot.slane %v1540_v14, 3  ;;  %v121_v39 = vrot.slane %v1540_v14, 4 }
  0x88   :  { %v55_v20 = vpop.permute.xlu0 %54  ;;  %v87_v21 = vrot.slane %v1542_v16, 1  ;;  %v95_v22 = vrot.slane %v1542_v16, 2  ;;  %v103_v23 = vrot.slane %v1542_v16, 3  ;;  %v111_v24 = vrot.slane %v1542_v16, 4 }
  0x89   :  { %v70_v25 = vmul.f32 %v1237_v12, %v55_v20  ;;  %v60_v26 = vpop.permute.xlu1 %59  ;;  %v120_v34 = vrot.slane %v1542_v16, 5  ;;  %v129_v54 = vrot.slane %v1542_v16, 6  ;;  %v130_v55 = vrot.slane %v1540_v14, 5 }
  0x8a   :  { %v71_v27 = vmul.f32 %v1237_v12, %v60_v26  ;;  %v88_v28 = vsel %vm77_vm5, %v1540_v14, %v87_v21  ;;  %v97_v29 = vsel %vm77_vm5, %v96_v17, %v95_v22  ;;  %v105_v30 = vsel %vm77_vm5, %v104_v18, %v103_v23 }
  0x8b   :  { %v89_v31 = vrot.slane %v70_v25, 7  ;;  %v98_v32 = vsel %vm80_vm6, %v70_v25, %v97_v29  ;;  %v106_v33 = vrot.slane %v70_v25, 1  ;;  %v113_v38 = vsel %vm77_vm5, %v112_v19, %v111_v24 }
  0x8c   :  { %v91_v36 = vrot.slane %v71_v27, 6  ;;  %v99_v37 = vrot.slane %v71_v27, 7  ;;  %v114_v42 = vrot.slane %v70_v25, 2  ;;  %v116_v50 = vrot.slane %v71_v27, 1 }
  0x8d   :  { %v90_v40 = vsel %vm80_vm6, %v89_v31, %v88_v28  ;;  %v107_v41 = vsel %vm80_vm6, %v106_v33, %v105_v30  ;;  %v122_v51 = vsel %vm77_vm5, %v121_v39, %v120_v34  ;;  %v123_v52 = vrot.slane %v70_v25, 3 }
  0x8e   :  { %v92_v43 = vsel %vm83_vm7, %v91_v36, %v90_v40  ;;  %v100_v44 = vsel %vm83_vm7, %v99_v37, %v98_v32  ;;  %v108_v45 = vsel %vm83_vm7, %v71_v27, %v107_v41  ;;  %v115_v49 = vsel %vm80_vm6, %v114_v42, %v113_v38 }
  0x8f   :  { %v94_v46 = vadd.f32 %v1236_v35, %v92_v43  ;;  %v1567_v47 = vadd.f32 %v1236_v35, %v100_v44  ;;  %v1569_v48 = vadd.f32 %v1236_v35, %v108_v45  ;;  %v125_v53 = vrot.slane %v71_v27, 2 }
  0x90   :  { %v132_v56 = vrot.slane %v70_v25, 4  ;;  %v117_v57 = vsel %vm83_vm7, %v116_v50, %v115_v49  ;;  %v124_v58 = vsel %vm80_vm6, %v123_v52, %v122_v51  ;;  %v134_v59 = vrot.slane %v71_v27, 3 }
  0x91   :  { %v138_v60 = vrot.slane %v1542_v16, 7  ;;  %v1578_v61 = vadd.f32 %v1236_v35, %v117_v57  ;;  %v126_v62 = vsel %vm83_vm7, %v125_v53, %v124_v58  ;;  %v131_v63 = vsel %vm77_vm5, %v130_v55, %v129_v54 }
  0x92   :  { %v139_v0 = vrot.slane %v1540_v14, 6  ;;  %v1583_v1 = vadd.f32 %v1236_v35, %v126_v62  ;;  %v133_v5 = vsel %vm80_vm6, %v132_v56, %v131_v63  ;;  %v141_v7 = vrot.slane %v70_v25, 5 }
  0x93   :  { %v143_v8 = vrot.slane %v71_v27, 4  ;;  %v135_v9 = vsel %vm83_vm7, %v134_v59, %v133_v5  ;;  %v76_v17 = vrot.slane %v1540_v14, 7  ;;  %v79_v18 = vrot.slane %v70_v25, 6 }
  0x94   :  { %v140_v10 = vsel %vm77_vm5, %v139_v0, %v138_v60  ;;  %v1588_v11 = vadd.f32 %v1236_v35, %v135_v9  ;;  %v82_v20 = vrot.slane %v71_v27, 5  ;;  %v1439_v14 = vmov 1966171168  }
  0x95   :  { %v142_v12 = vsel %vm80_vm6, %v141_v7, %v140_v10  ;;  %v78_v19 = vsel %vm77_vm5, %v76_v17, %v1542_v16  ;;  %v756_v16 = vunpack.c.l.s4 %v1439_v14  ;;  %v758_v25 = vlaneseq }
  0x96   :  { %v144_v13 = vsel %vm83_vm7, %v143_v8, %v142_v12  ;;  %v81_v21 = vsel %vm80_vm6, %v79_v18, %v78_v19 }
  0x97   :  { %v1592_v15 = vadd.f32 %v1236_v35, %v144_v13  ;;  %v84_v22 = vsel %vm83_vm7, %v82_v20, %v81_v21  ;;  %v757_v32 = vunpack.c.0.s8 %v756_v16  ;;  %v759_v33 = vshrl.u32 %v758_v25, 7 }
  0x98   :  { %v86_v23 = vadd.f32 %v1236_v35, %v84_v22 }
  0x99   :  { %v1606_v34 = vsub.s32 %v757_v32, %v759_v33  ;;  %v1609_v38 = vsub.s32 0, %v759_v33 }
  0xda   :  { %v224_v24 = vpop.f32.mrb[0].mxu0 }
  0xdb   :  { %v228_v26 = vadd.f32 %v224_v24, %v86_v23  ;;  %v1290_v28 = vpop.f32.mrb[1].mxu0 }
  0xdd   :  { %1394 = vtanh.f32 %v228_v26 }
  0xe7   :  { %v1395_v29 = vpop.eup %1394 }
  0xe8   :  { %1296 = vmatmul.mubr.msk.f32.vlgmr.msra.gmra.mrb[0].mxu1 %vm150_vm4, %v1395_v29  ;;  %v761_v35 = vrot.slane %v1395_v29, %v1606_v34 }
  0xe9   :  { %1362 = vmatpush3.bf16.msk.msra.mxu1 %vm1498_vm2, %v1495_v3  ;;  %1309 = vmatprep.mubr.msk.f32.mxu1 %vm1436_vm3, %v1437_v6 }
  0xea   :  { %1367 = vmatprep.subr.bf16.mxu1 %v1434_v2  ;;  %v762_v37 = vcombine.high %v761_v35, %v761_v35  ;;  %v769_v40 = vrot.slane %v761_v35, %v1606_v34 }
  0xec   :  { %v776_v43 = vrot.slane %v762_v37, %v1606_v34  ;;  %v777_v49 = vcombine.high %v769_v40, %v769_v40 }
  0xee   :  { %v778_v54 = vcombine.high %v776_v43, %v776_v43 }
 0x1bb   :  { %v299_v27 = vpop.f32.mrb[0].mxu1 }
 0x1bc   :  { %v303_v30 = vadd.f32 %v299_v27, %v94_v46  ;;  %v1297_v31 = vpop.f32.mrb[1].mxu1 }
 0x1be   :  { %1396 = vtanh.f32 %v303_v30 }
 0x1c8   :  { %v1397_v36 = vpop.eup %1396 }
 0x1c9   :  { %v789_v39 = vrot.slane %v1397_v36, %v1606_v34  ;;  %1303 = vmatmul.mubr.msk.f32.vlgmr.msra.gmra.mrb[2].mxu0 %vm150_vm4, %v1397_v36 }
 0x1ca   :  { %1366 = vmatpush3.bf16.msk.msra.mxu0 %vm1498_vm2, %v1495_v3  ;;  %1316 = vmatprep.mubr.msk.f32.mxu0 %vm1436_vm3, %v1437_v6 }
 0x1cb   :  { %v790_v41 = vcombine.high %v789_v39, %v789_v39  ;;  %v797_v42 = vrot.slane %v789_v39, %v1606_v34  ;;  %1371 = vmatprep.subr.bf16.mxu0 %v1434_v2 }
 0x1cd   :  { %v804_v44 = vrot.slane %v790_v41, %v1606_v34  ;;  %v805_v45 = vcombine.high %v797_v42, %v797_v42  ;;  %v955_v46 = vrot.slane %v797_v42, %v1609_v38 }
 0x1cf   :  { %v806_v50 = vcombine.high %v804_v44, %v804_v44  ;;  %v959_v51 = vrot.slane %v804_v44, %v1609_v38  ;;  %v963_v52 = vrot.slane %v805_v45, %v1609_v38  ;;  %v1093_v53 = vsel %vm1092_vm8, %v769_v40, %v955_v46 }
 0x1d1   :  { %v967_v55 = vrot.slane %v806_v50, %v1609_v38  ;;  %v1094_v56 = vsel %vm1092_vm8, %v776_v43, %v959_v51  ;;  %v1095_v57 = vsel %vm1092_vm8, %v777_v49, %v963_v52 }
 0x1d3   :  { %v1096_v58 = vsel %vm1092_vm8, %v778_v54, %v967_v55 }
 0x29c   :  { %v374_v59 = vpop.f32.mrb[2].mxu0 }
 0x29d   :  { %v378_v60 = vadd.f32 %v374_v59, %v1567_v47  ;;  %v1304_v62 = vpop.f32.mrb[3].mxu0 }
 0x29f   :  { %1398 = vtanh.f32 %v378_v60 }
 0x2a9   :  { %v1399_v63 = vpop.eup %1398 }
 0x2aa   :  { %v813_v0 = vrot.slane %v1399_v63, %v1606_v34  ;;  %1310 = vmatmul.mubr.msk.f32.vlgmr.msra.gmra.mrb[2].mxu1 %vm150_vm4, %v1399_v63 }
 0x2ab   :  { %1370 = vmatpush3.bf16.msk.msra.mxu1 %vm1498_vm2, %v1495_v3  ;;  %1323 = vmatprep.mubr.msk.f32.mxu1 %vm1436_vm3, %v1437_v6 }
 0x2ac   :  { %v814_v5 = vcombine.high %v813_v0, %v813_v0  ;;  %v821_v7 = vrot.slane %v813_v0, %v1606_v34  ;;  %1375 = vmatprep.subr.bf16.mxu1 %v1434_v2 }
 0x2ae   :  { %v828_v47 = vrot.slane %v814_v5, %v1606_v34  ;;  %v829_v8 = vcombine.high %v821_v7, %v821_v7  ;;  %v975_v9 = vrot.slane %v821_v7, %v1609_v38 }
 0x2b0   :  { %v830_v10 = vcombine.high %v828_v47, %v828_v47  ;;  %v979_v12 = vrot.slane %v828_v47, %v1609_v38  ;;  %v983_v13 = vrot.slane %v829_v8, %v1609_v38  ;;  %v1097_v17 = vsel %vm154_vm0, %v1093_v53, %v975_v9 }
 0x2b2   :  { %v987_v18 = vrot.slane %v830_v10, %v1609_v38  ;;  %v1098_v19 = vsel %vm154_vm0, %v1094_v56, %v979_v12  ;;  %v1099_v20 = vsel %vm154_vm0, %v1095_v57, %v983_v13 }
 0x2b4   :  { %v1100_v21 = vsel %vm154_vm0, %v1096_v58, %v987_v18 }
 0x37d   :  { %v449_v22 = vpop.f32.mrb[2].mxu1 }
 0x37e   :  { %v453_v23 = vadd.f32 %v449_v22, %v1569_v48  ;;  %v1311_v24 = vpop.f32.mrb[3].mxu1 }
 0x380   :  { %1400 = vtanh.f32 %v453_v23 }
 0x38a   :  { %v1401_v26 = vpop.eup %1400 }
 0x38b   :  { %v837_v28 = vrot.slane %v1401_v26, %v1606_v34  ;;  %1317 = vmatmul.mubr.msk.f32.vlgmr.msra.gmra.mrb[4].mxu0 %vm150_vm4, %v1401_v26 }
 0x38c   :  { %1374 = vmatpush3.bf16.msk.msra.mxu0 %vm1498_vm2, %v1495_v3  ;;  %1330 = vmatprep.mubr.msk.f32.mxu0 %vm1436_vm3, %v1437_v6 }
 0x38d   :  { %v838_v29 = vcombine.high %v837_v28, %v837_v28  ;;  %v845_v14 = vrot.slane %v837_v28, %v1606_v34  ;;  %1379 = vmatprep.subr.bf16.mxu0 %v1434_v2 }
 0x38f   :  { %v852_v48 = vrot.slane %v838_v29, %v1606_v34  ;;  %v853_v16 = vcombine.high %v845_v14, %v845_v14  ;;  %v995_v25 = vrot.slane %v845_v14, %v1609_v38 }
 0x391   :  { %v854_v27 = vcombine.high %v852_v48, %v852_v48  ;;  %v999_v30 = vrot.slane %v852_v48, %v1609_v38  ;;  %v1003_v31 = vrot.slane %v853_v16, %v1609_v38  ;;  %v1102_v32 = vsel %vm1101_vm9, %v1097_v17, %v995_v25 }
 0x393   :  { %v1007_v33 = vrot.slane %v854_v27, %v1609_v38  ;;  %v1103_v35 = vsel %vm1101_vm9, %v1098_v19, %v999_v30  ;;  %v1104_v36 = vsel %vm1101_vm9, %v1099_v20, %v1003_v31  ;;  %v1130_v31 = vld [vmem:[%s1738_s4] sm:$0xff] }
 0x395   :  { %v1105_v37 = vsel %vm1101_vm9, %v1100_v21, %v1007_v33 }
 0x45e   :  { %v524_v39 = vpop.f32.mrb[4].mxu0 }
 0x45f   :  { %v528_v2 = vadd.f32 %v524_v39, %v1578_v61  ;;  %v1318_v40 = vpop.f32.mrb[5].mxu0 }
 0x461   :  { %1402 = vtanh.f32 %v528_v2 }
 0x46b   :  { %v1403_v41 = vpop.eup %1402 }
 0x46c   :  { %v861_v42 = vrot.slane %v1403_v41, %v1606_v34  ;;  %1324 = vmatmul.mubr.msk.f32.vlgmr.msra.gmra.mrb[4].mxu1 %vm150_vm4, %v1403_v41 }
 0x46d   :  { %1378 = vmatpush3.bf16.msk.msra.mxu1 %vm1498_vm2, %v1495_v3  ;;  %1337 = vmatprep.mubr.msk.f32.mxu1 %vm1436_vm3, %v1437_v6 }
 0x46e   :  { %v862_v43 = vcombine.high %v861_v42, %v861_v42  ;;  %v869_v44 = vrot.slane %v861_v42, %v1606_v34 }
 0x470   :  { %v876_v61 = vrot.slane %v862_v43, %v1606_v34  ;;  %v877_v45 = vcombine.high %v869_v44, %v869_v44  ;;  %v1015_v46 = vrot.slane %v869_v44, %v1609_v38 }
 0x472   :  { %v878_v49 = vcombine.high %v876_v61, %v876_v61  ;;  %v1019_v50 = vrot.slane %v876_v61, %v1609_v38  ;;  %v1023_v51 = vrot.slane %v877_v45, %v1609_v38  ;;  %v1107_v52 = vsel %vm1106_vm10, %v1102_v32, %v1015_v46  ;;  %v1131_v32 = vld [vmem:[%s1738_s4 + $0x8] sm:$0x3]  ;;  %s1440_s4 = smov [#allocation2]  }
 0x473   :  { %v1380_v33 = vpack.c.bf16 %v1131_v32, %v1130_v31  ;;  %s1223_s22 = sshll.u32 %s1440_s4, 4  ;;  %s1224_s22 = int_to_ptr.vmem [resolvable:$true] %s1223_s22 }
 0x474   :  { %v1027_v3 = vrot.slane %v878_v49, %v1609_v38  ;;  %v1108_v53 = vsel %vm1106_vm10, %v1103_v35, %v1019_v50  ;;  %v1109_v54 = vsel %vm1106_vm10, %v1104_v36, %v1023_v51  ;;  %s1410_s23 = scalar_lea.vmem %s1224_s22, 512  ;;  %p1415_p1 = scmp.lt.s32.totalorder %s1224_s22, %s1224_s22 }
 0x475   :  { %p1411_p0 = scmp.ne.s32.totalorder %s1224_s22, %s1410_s23  ;;  %p1416_p2 = scmp.lt.s32.totalorder %s1410_s23, %s1410_s23 }
 0x476   :  { %v1110_v55 = vsel %vm1106_vm10, %v1105_v37, %v1027_v3 }
 0x477   :  { %p1417_p3 = por %p1416_p2, %p1415_p1 }
 0x479   :  { %p1418_p4 = pnand %p1417_p3, %p1411_p0 }
 0x53f   :  { %v599_v56 = vpop.f32.mrb[4].mxu1 }
 0x540   :  { %v603_v57 = vadd.f32 %v599_v56, %v1583_v1  ;;  %v1325_v58 = vpop.f32.mrb[5].mxu1 }
 0x542   :  { %1404 = vtanh.f32 %v603_v57 }
 0x54c   :  { %v1405_v59 = vpop.eup %1404 }
 0x54d   :  { %v885_v60 = vrot.slane %v1405_v59, %v1606_v34  ;;  %1331 = vmatmul.mubr.msk.f32.vlgmr.msra.gmra.mrb[6].mxu0 %vm150_vm4, %v1405_v59 }
 0x54e   :  { %1344 = vmatprep.mubr.msk.f32.mxu0 %vm1436_vm3, %v1437_v6  ;;  %1382 = vmatpush3.bf16.msk.msra.mxu0 %vm1498_vm2, %v1380_v33 }
 0x54f   :  { %v886_v62 = vcombine.high %v885_v60, %v885_v60  ;;  %v893_v63 = vrot.slane %v885_v60, %v1606_v34 }
 0x551   :  { %v900_v0 = vrot.slane %v886_v62, %v1606_v34  ;;  %v901_v5 = vcombine.high %v893_v63, %v893_v63  ;;  %v1035_v7 = vrot.slane %v893_v63, %v1609_v38 }
 0x553   :  { %v902_v1 = vcombine.high %v900_v0, %v900_v0  ;;  %v1039_v47 = vrot.slane %v900_v0, %v1609_v38  ;;  %v1043_v8 = vrot.slane %v901_v5, %v1609_v38  ;;  %v1112_v9 = vsel %vm1111_vm11, %v1107_v52, %v1035_v7 }
 0x555   :  { %v1047_v10 = vrot.slane %v902_v1, %v1609_v38  ;;  %v1113_v12 = vsel %vm1111_vm11, %v1108_v53, %v1039_v47  ;;  %v1114_v13 = vsel %vm1111_vm11, %v1109_v54, %v1043_v8 }
 0x557   :  { %v1115_v6 = vsel %vm1111_vm11, %v1110_v55, %v1047_v10 }
 0x620   :  { %v674_v17 = vpop.f32.mrb[6].mxu0 }
 0x621   :  { %v678_v18 = vadd.f32 %v674_v17, %v1588_v11  ;;  %v1332_v19 = vpop.f32.mrb[7].mxu0 }
 0x623   :  { %1406 = vtanh.f32 %v678_v18 }
 0x62d   :  { %v1407_v20 = vpop.eup %1406 }
 0x62e   :  { %v909_v21 = vrot.slane %v1407_v20, %v1606_v34  ;;  %1338 = vmatmul.mubr.msk.f32.vlgmr.msra.gmra.mrb[6].mxu1 %vm150_vm4, %v1407_v20 }
 0x630   :  { %v910_v22 = vcombine.high %v909_v21, %v909_v21  ;;  %v917_v23 = vrot.slane %v909_v21, %v1606_v34 }
 0x632   :  { %v924_v24 = vrot.slane %v910_v22, %v1606_v34  ;;  %v925_v26 = vcombine.high %v917_v23, %v917_v23  ;;  %v1055_v28 = vrot.slane %v917_v23, %v1609_v38 }
 0x634   :  { %v926_v29 = vcombine.high %v924_v24, %v924_v24  ;;  %v1059_v14 = vrot.slane %v924_v24, %v1609_v38  ;;  %v1063_v11 = vrot.slane %v925_v26, %v1609_v38  ;;  %v1117_v48 = vsel %vm1116_vm12, %v1112_v9, %v1055_v28 }
 0x636   :  { %v1067_v16 = vrot.slane %v926_v29, %v1609_v38  ;;  %v1118_v25 = vsel %vm1116_vm12, %v1113_v12, %v1059_v14  ;;  %v1119_v27 = vsel %vm1116_vm12, %v1114_v13, %v1063_v11 }
 0x638   :  { %v1120_v30 = vsel %vm1116_vm12, %v1115_v6, %v1067_v16 }
 0x701   :  { %v749_v35 = vpop.f32.mrb[6].mxu1 }
 0x702   :  { %v753_v36 = vadd.f32 %v749_v35, %v1592_v15  ;;  %v1339_v37 = vpop.f32.mrb[7].mxu1 }
 0x704   :  { %1408 = vtanh.f32 %v753_v36 }
 0x70e   :  { %v1409_v39 = vpop.eup %1408 }
 0x70f   :  { %v934_v2 = vrot.slane %v1409_v39, %v1606_v34  ;;  %1345 = vmatmul.mubr.msk.f32.vlgmr.msra.gmra.mrb[8].mxu0 %vm150_vm4, %v1409_v39 }
 0x711   :  { %v935_v40 = vcombine.high %v934_v2, %v934_v2  ;;  %v942_v41 = vrot.slane %v934_v2, %v1606_v34 }
 0x713   :  { %v949_v42 = vrot.slane %v935_v40, %v1606_v34  ;;  %v950_v43 = vcombine.high %v942_v41, %v942_v41  ;;  %v1075_v4 = vrot.slane %v942_v41, %v1609_v38 }
 0x715   :  { %v951_v44 = vcombine.high %v949_v42, %v949_v42  ;;  %v1079_v61 = vrot.slane %v949_v42, %v1609_v38  ;;  %v1083_v15 = vrot.slane %v950_v43, %v1609_v38  ;;  %v1122_v45 = vsel %vm1121_vm13, %v1117_v48, %v1075_v4 }
 0x716   :  { %1126 = vst.msk [vmem:[#allocation2] sm:$0xff] %vm150_vm4, %v1122_v45 }
 0x717   :  { %v1087_v46 = vrot.slane %v951_v44, %v1609_v38  ;;  %v1123_v49 = vsel %vm1121_vm13, %v1118_v25, %v1079_v61  ;;  %v1124_v50 = vsel %vm1121_vm13, %v1119_v27, %v1083_v15 }
 0x718   :  { %1127 = vst.msk [vmem:[#allocation2 + $0x8] sm:$0xff] %vm150_vm4, %v1123_v49  ;;  %1128 = vst.msk [vmem:[#allocation2 + $0x10] sm:$0xff] %vm150_vm4, %v1124_v50 }
 0x719   :  { %v1125_v34 = vsel %vm1121_vm13, %v1120_v30, %v1087_v46 }
 0x71a   :  { %1129 = vst.msk [vmem:[#allocation2 + $0x18] sm:$0xff] %vm150_vm4, %v1125_v34 }
 0x71b   :  { %1421 = shalt.err (!%p1418_p4)
}
 0x71c   :  { %s1422_s26 = scalar_lea.hbm %s1742_s8, 512 }
 0x71d   :  { %p1423_p5 = scmp.ne.s32.totalorder %s1742_s8, %s1422_s26  ;;  %p1426_p6 = scmp.lt.u32.totalorder %s1422_s26, %s1742_s8 }
 0x71f   :  { %p1428_p7 = pnand %p1426_p6, %p1423_p5 }
 0x721   :  { %1431 = shalt.err (!%p1428_p7)
}
 0x722   :  { %s1441_s9 = smov 128   ;;  %s1442_s10 = smov 8   ;;  %v1254_v38 = vld [vmem:[%s1739_s5] ss:$0 sm:$0xff]  ;;  %vm1214_vm14 = vcmask 11264  }
 0x723   :  { %1229 = dma.vmem_to_hbm [thread:$0]  %s1224_s22, 512, %s1742_s8, [#allocation3], %s1441_s9, %s1441_s9, %s1442_s10  }
 0x7e2   :  { %v1210_v51 = vpop.f32.mrb[8].mxu0 }
 0x7e3   :  { %v1211_v52 = vadd.f32 %v1254_v38, %v1210_v51  ;;  %v1346_v3 = vpop.f32.mrb[9].mxu0 }
 0x7e5   :  { %1215 = vst.msk [vmem:[%s1741_s7] sm:$0xf] %vm1214_vm14, %v1211_v52 }
 0x7e6   :  { %1432 = dma.done.wait [#allocation3], 512  }
 0x7e7   :  { %1433 = vsyncadd [#allocation3], 4294966784 }
 0x7e8   :  { %1235 = vsyncpa [#allocation3], 1 }

</bundles_post_ra>
